<compile_context>
chip_gen: v7x
topology: tpu7x:2x2x1
jax: 0.10.0
libtpu: 0.0.40
codegen_flags: <defaults>
</compile_context>

<pallas_src>
import jax
import jax.numpy as jnp
from jax.experimental import pallas as pl
from jax.experimental.pallas import tpu as pltpu

_LANE = 128                      # lane quantum
_SUB = 8                         # sublane quantum
_MAX_LANES = 8192                # lane width of the flattened 2-D view
_TARGET_BLOCK_BYTES = 4 << 20    # ~4 MiB per block (review: 4-8 MiB sweet spot)


def _round_up(x, m):
    return ((x + m - 1) // m) * m


def _clamp_kernel(x_ref, lo_ref, hi_ref, o_ref):
    """out = min(max(x, lo), hi); lo/hi are (8, L), x/o are (tile_r, L)."""
    tile_r, lanes = x_ref.shape
    lo = lo_ref[...]                      # (8, L)
    hi = hi_ref[...]                      # (8, L)
    x = x_ref[...]                        # (tile_r, L), tile_r % 8 == 0
    if tile_r == _SUB:
        o_ref[...] = jnp.minimum(jnp.maximum(x, lo), hi)
    else:
        g = tile_r // _SUB
        # Leading-dim split keeps the (8, 128)-tiled minor dims intact, so the
        # reshape is layout-free; lo/hi broadcast along the untiled group dim.
        y = jnp.minimum(jnp.maximum(x.reshape(g, _SUB, lanes), lo), hi)
        o_ref[...] = y.reshape(tile_r, lanes)


def adjust_boxes(boxes, image):
    """Pallas equivalent of the PyTorch adjust_boxes.forward.

    boxes: (batch, num_boxes, 4), last axis = [x_min, y_min, x_max, y_max]
    image: (batch, channels, height, width) — only its static shape is used.
    """
    _, _, height, width = image.shape
    B, N, four = boxes.shape
    assert four == 4, "boxes last dim must be 4"
    dtype = boxes.dtype
    itemsize = jnp.dtype(dtype).itemsize

    total = B * N * 4

    # ---- choose the flattened (R_pad, L) view --------------------------------
    if total >= _SUB * _MAX_LANES:
        L = _MAX_LANES
    else:
        # Smallest multiple of 128 that holds everything in <= 8 sublane rows.
        L = min(_MAX_LANES, max(_LANE, _round_up(pl.cdiv(total, _SUB), _LANE)))
    # Column-block starts are multiples of L; L % 4 == 0 keeps the period-4
    # lo/hi pattern aligned with the coordinate index for every block.
    assert L % _LANE == 0 and L % 4 == 0

    R = pl.cdiv(total, L)
    R_pad = _round_up(R, _SUB)           # sublane-align the 2-D view

    # Row-tile: target ~4 MiB per block, keep >= 2 blocks when possible so both
    # v7x TensorCores get work, always a multiple of 8.
    max_tile_r = max(_SUB, (_TARGET_BLOCK_BYTES // (L * itemsize)) // _SUB * _SUB)
    if R_pad > max_tile_r:
        tile_r = max_tile_r
    elif R_pad >= 2 * _SUB:
        tile_r = _round_up(pl.cdiv(R_pad, 2), _SUB)
    else:
        tile_r = R_pad
    assert tile_r % _SUB == 0
    grid = (pl.cdiv(R_pad, tile_r),)     # ragged last block handled by Pallas

    # ---- flatten + pad (padded tail is sliced off before returning) ----------
    flat = boxes.reshape(total)
    pad = R_pad * L - total
    if pad:
        flat = jnp.pad(flat, (0, pad))
    x2d = flat.reshape(R_pad, L)

    # ---- per-coordinate clamp bounds (period-4 pattern along lanes) ----------
    # NOTE: width/height are cast to the boxes dtype; for bf16/fp16 boxes with
    # image dims that are not exactly representable the bound is rounded.
    if jnp.issubdtype(dtype, jnp.floating):
        big, small = jnp.inf, -jnp.inf
    else:
        big, small = jnp.iinfo(dtype).max, jnp.iinfo(dtype).min
    lo_pat = jnp.array([0, 0, small, small], dtype=dtype)
    hi_pat = jnp.array([big, big, width, height], dtype=dtype)
    lo8 = jnp.broadcast_to(jnp.tile(lo_pat, L // 4), (_SUB, L))   # (8, L)
    hi8 = jnp.broadcast_to(jnp.tile(hi_pat, L // 4), (_SUB, L))   # (8, L)

    out2d = pl.pallas_call(
        _clamp_kernel,
        out_shape=jax.ShapeDtypeStruct((R_pad, L), dtype),
        grid_spec=pltpu.PrefetchScalarGridSpec(
            num_scalar_prefetch=0,
            grid=grid,
            in_specs=[
                pl.BlockSpec((tile_r, L), lambda i: (i, 0)),
                pl.BlockSpec((_SUB, L), lambda i: (0, 0)),   # DMA'd once
                pl.BlockSpec((_SUB, L), lambda i: (0, 0)),   # DMA'd once
            ],
            out_specs=pl.BlockSpec((tile_r, L), lambda i: (i, 0)),
        ),
        input_output_aliases={0: 0},     # in-place clamp over the slab
        compiler_params=pltpu.CompilerParams(
            dimension_semantics=("parallel",),
            vmem_limit_bytes=48 << 20),  # covers v5e's 16 MiB scoped default,
                                         # leaves headroom on v7x's 64 MiB VMEM
    )(x2d, lo8, hi8)

    return out2d.reshape(R_pad * L)[:total].reshape(B, N, 4)


if __name__ == "__main__":
    key = jax.random.PRNGKey(0)
    k_boxes, k_img = jax.random.split(key)

    batch, num_boxes = 2, 8
    channels, height, width = 4, 16, 16

    # Boxes with coordinates spread around/outside [0, 16] so clamping matters.
    boxes = jax.random.uniform(
        k_boxes, (batch, num_boxes, 4), dtype=jnp.float32,
        minval=-8.0, maxval=24.0)
    image = jax.random.normal(
        k_img, (batch, channels, height, width), dtype=jnp.float32)

    out = adjust_boxes(boxes, image)
    out = jax.block_until_ready(out)

    # Reference check in plain JAX.
    ref = boxes
    ref = ref.at[:, :, 0].set(jnp.maximum(ref[:, :, 0], 0.0))
    ref = ref.at[:, :, 1].set(jnp.maximum(ref[:, :, 1], 0.0))
    ref = ref.at[:, :, 2].set(jnp.minimum(ref[:, :, 2], float(width)))
    ref = ref.at[:, :, 3].set(jnp.minimum(ref[:, :, 3], float(height)))
    assert out.shape == boxes.shape and out.dtype == boxes.dtype
    assert jnp.allclose(out, ref), "mismatch vs reference"

    print("KERNEL_OK")
</pallas_src>

<mosaic_0001>
module attributes {stable_mosaic.version = 11 : i64} {
  func.func @_clamp_kernel(%arg0: i32, %arg1: memref<8x128xf32, #tpu.memory_space<vmem>>, %arg2: memref<8x128xf32, #tpu.memory_space<vmem>>, %arg3: memref<8x128xf32, #tpu.memory_space<vmem>>, %arg4: memref<8x128xf32, #tpu.memory_space<vmem>>) attributes {dimension_semantics = [#tpu.dimension_semantics<parallel>], iteration_bounds = array<i64: 1>, scalar_prefetch = 0 : i64, scratch_operands = 0 : i64, tpu.core_type = #tpu.core_type<tc>, window_params = [{transform_indices = @transform_0, window_bounds = array<i64: 8, 128>}, {pipeline_mode = #tpu.pipeline_mode<synchronous>, transform_indices = @transform_1, window_bounds = array<i64: 8, 128>}, {pipeline_mode = #tpu.pipeline_mode<synchronous>, transform_indices = @transform_2, window_bounds = array<i64: 8, 128>}, {transform_indices = @transform_3, window_bounds = array<i64: 8, 128>}]} {
    %c0 = arith.constant 0 : index
    %c0_0 = arith.constant 0 : index
    %0 = vector.load %arg2[%c0, %c0_0] : memref<8x128xf32, #tpu.memory_space<vmem>>, vector<8x128xf32>
    %c0_1 = arith.constant 0 : index
    %c0_2 = arith.constant 0 : index
    %1 = vector.load %arg3[%c0_1, %c0_2] : memref<8x128xf32, #tpu.memory_space<vmem>>, vector<8x128xf32>
    %c0_3 = arith.constant 0 : index
    %c0_4 = arith.constant 0 : index
    %2 = vector.load %arg1[%c0_3, %c0_4] : memref<8x128xf32, #tpu.memory_space<vmem>>, vector<8x128xf32>
    %3 = arith.maximumf %2, %0 : vector<8x128xf32>
    %4 = arith.minimumf %3, %1 : vector<8x128xf32>
    %c0_5 = arith.constant 0 : index
    %c0_6 = arith.constant 0 : index
    %5 = vector.load %arg4[%c0_5, %c0_6] : memref<8x128xf32, #tpu.memory_space<vmem>>, vector<8x128xf32>
    tpu.vector_store %arg4[%c0_5, %c0_6], %4 {strides = array<i32>} : memref<8x128xf32, #tpu.memory_space<vmem>>, vector<8x128xf32>,
    return
  }
  func.func @transform_0(%arg0: i32) -> (i32, i32) {
    %c0_i32 = arith.constant 0 : i32
    %c0_i32_0 = arith.constant 0 : i32
    return %arg0, %c0_i32 : i32, i32
  }
  func.func @transform_1(%arg0: i32) -> (i32, i32) {
    %c0_i32 = arith.constant 0 : i32
    %c0_i32_0 = arith.constant 0 : i32
    %c0_i32_1 = arith.constant 0 : i32
    return %c0_i32, %c0_i32_0 : i32, i32
  }
  func.func @transform_2(%arg0: i32) -> (i32, i32) {
    %c0_i32 = arith.constant 0 : i32
    %c0_i32_0 = arith.constant 0 : i32
    %c0_i32_1 = arith.constant 0 : i32
    return %c0_i32, %c0_i32_0 : i32, i32
  }
  func.func @transform_3(%arg0: i32) -> (i32, i32) {
    %c0_i32 = arith.constant 0 : i32
    %c0_i32_0 = arith.constant 0 : i32
    return %arg0, %c0_i32 : i32, i32
  }
}

</mosaic_0001>

<bundles_post_ra>
// kernel: tpu_custom_call.1
= control target key start
LH: loop header
LB: loop body
LE: loop exit
PB: predicated region body
PF: predicated region fallthrough
CT: control target
= control target key end

     0   :  { %8 = vsyncpa [#allocation3], 0  ;;  %s150_s0 = inlined_call_operand.hbm [shape: f32[8,128], index: 0, kind: input, shape index: {}, may-alias: {0,3}]   ;;  %s151_s1 = inlined_call_operand.vmem [shape: f32[8,128], index: 1, kind: input, shape index: {}]   ;;  %s152_s2 = inlined_call_operand.vmem [shape: f32[8,128], index: 2, kind: input, shape index: {}]   ;;  %s153_s3 = inlined_call_operand.hbm [shape: f32[8,128], index: 3, kind: output, shape index: {}, may-alias: {0,3}]  }
   0x1   :  { %9 = vsyncpa [#allocation4], 0  ;;  %s98_s12 = smov [#allocation2]   ;;  %s50_s16 = scalar_lea.hbm %s150_s0, 128 }
   0x2   :  { %s16_s13 = sshll.u32 %s98_s12, 4  ;;  %p51_p0 = scmp.ne.s32.totalorder %s150_s0, %s50_s16  ;;  %s17_s13 = int_to_ptr.vmem [resolvable:$true] %s16_s13 }
   0x3   :  { %p54_p1 = scmp.lt.u32.totalorder %s50_s16, %s150_s0 }
   0x5   :  { %p56_p2 = pnand %p54_p1, %p51_p0 }
   0x7   :  { %59 = shalt.err (!%p56_p2)
}
   0x8   :  { %s60_s21 = scalar_lea.vmem %s17_s13, 128  ;;  %p65_p4 = scmp.lt.s32.totalorder %s17_s13, %s17_s13 }
   0x9   :  { %p61_p3 = scmp.ne.s32.totalorder %s17_s13, %s60_s21  ;;  %p66_p5 = scmp.lt.s32.totalorder %s60_s21, %s60_s21 }
   0xb   :  { %p67_p6 = por %p66_p5, %p65_p4 }
   0xd   :  { %p68_p7 = pnand %p67_p6, %p61_p3 }
   0xf   :  { %71 = shalt.err (!%p68_p7)
}
  0x10   :  { %19 = dma.hbm_to_vmem [thread:$0]  %s150_s0, 128, %s17_s13, [#allocation3]  }
  0x11   :  { %94 = dma.done.wait [#allocation3], 128  }
  0x12   :  { %95 = vsyncadd [#allocation3], 4294967168  ;;  %v27_v0 = vld [vmem:[%s151_s1] sm:$0xff]  ;;  %s99_s28 = smov [#allocation5]  }
  0x13   :  { %v28_v1 = vld [vmem:[%s152_s2] sm:$0xff]  ;;  %s39_s29 = sshll.u32 %s99_s28, 4  ;;  %s40_s29 = int_to_ptr.vmem [resolvable:$true] %s39_s29 }
  0x14   :  { %v29_v2 = vld [vmem:[#allocation2] sm:$0xff]  ;;  %s72_s30 = scalar_lea.vmem %s40_s29, 128  ;;  %p77_p9 = scmp.lt.s32.totalorder %s40_s29, %s40_s29 }
  0x15   :  { %v30_v3 = vmax.f32 %v29_v2, %v27_v0  ;;  %p73_p8 = scmp.ne.s32.totalorder %s40_s29, %s72_s30  ;;  %p78_p10 = scmp.lt.s32.totalorder %s72_s30, %s72_s30 }
  0x17   :  { %v31_v4 = vmin.f32 %v30_v3, %v28_v1  ;;  %p79_p11 = por %p78_p10, %p77_p9 }
  0x19   :  { %32 = vst [vmem:[#allocation5] sm:$0xff] %v31_v4  ;;  %p80_p12 = pnand %p79_p11, %p73_p8 }
  0x1b   :  { %83 = shalt.err (!%p80_p12)
}
  0x1c   :  { %s84_s4 = scalar_lea.hbm %s153_s3, 128 }
  0x1d   :  { %p85_p13 = scmp.ne.s32.totalorder %s153_s3, %s84_s4  ;;  %p88_p0 = scmp.lt.u32.totalorder %s84_s4, %s153_s3 }
  0x1f   :  { %p90_p1 = pnand %p88_p0, %p85_p13 }
  0x21   :  { %93 = shalt.err (!%p90_p1)
}
  0x22   :  { %42 = dma.vmem_to_hbm [thread:$0]  %s40_s29, 128, %s153_s3, [#allocation4]  }
  0x23   :  { %96 = dma.done.wait [#allocation4], 128  }
  0x24   :  { %97 = vsyncadd [#allocation4], 4294967168 }
  0x25   :  { %46 = vsyncpa [#allocation3], 1 }
  0x26   :  { %47 = vsyncpa [#allocation4], 1 }

</bundles_post_ra>
